<compile_context>
chip_gen: v5e
topology: v5e:2x2
jax: 0.10.0
libtpu: 0.0.40
codegen_flags: <defaults>
</compile_context>

<pallas_src>
import functools
import math

import jax
import jax.numpy as jnp
from jax.experimental import pallas as pl
from jax.experimental.pallas import tpu as pltpu


def _prenet_kernel(x_ref, w_ref, add_ref, o_ref, *, batch, dim_in, dim_out):
    # x_ref   : (Tl, B*Din)  sequence tile; batch-major groups of Din lanes (free view)
    # w_ref   : (Din, Dout)  weight pre-scaled by sqrt(Dout); resident across the grid
    # add_ref : (Tl, Dout)   pe[l] + bias*sqrt(Dout) (f32), one row per sequence position
    # o_ref   : (Tl, B*Dout) output tile, batch-major groups of Dout lanes
    w = w_ref[...]
    add = add_ref[...]
    # Static unrolled loop over the (small) batch: each iteration is a full-height
    # (Tl, Din) x (Din, Dout) MXU matmul; the per-position add needs no broadcast and
    # is loaded from VMEM once (fetched from HBM once per sequence tile).
    for b in range(batch):
        x_b = x_ref[:, pl.ds(b * dim_in, dim_in)]
        y_b = jnp.dot(x_b, w, preferred_element_type=jnp.float32)
        o_ref[:, pl.ds(b * dim_out, dim_out)] = (y_b + add).astype(o_ref.dtype)
    # TODO(synk): dropout omitted (eval-mode identity); training-mode dropout would use
    # pltpu.prng_seed / pltpu.stateful_bernoulli and would forbid folding bias into pe.


def make_positional_encoding(max_len, dim, dtype=jnp.float32):
    position = jnp.arange(max_len, dtype=jnp.float32)[:, None]
    div_term = jnp.exp(
        jnp.arange(0, dim, 2, dtype=jnp.float32) * (-math.log(10000.0) / dim)
    )
    angles = position * div_term                               # (max_len, ceil(dim/2))
    pe = jnp.zeros((max_len, dim), dtype=jnp.float32)
    pe = pe.at[:, 0::2].set(jnp.sin(angles))
    pe = pe.at[:, 1::2].set(jnp.cos(angles)[:, : dim // 2])    # also correct for odd dim
    return pe.astype(dtype)


def _round_up(x, m):
    return ((x + m - 1) // m) * m


# Explicit scoped-VMEM limit: above v5e's 16 MiB default, comfortably inside v7x's
# 64 MiB physical (v5e/v6e have 128 MiB physical).
_VMEM_LIMIT_BYTES = 32 * 1024 * 1024


def _choose_seq_tile(L, B, per_l_bytes, vmem_budget, max_tile_positions=1024):
    """Sequence-tile length Tl (in positions of L) -> (Tl, needs_row_padding).

    Tl is a multiple of 8 (or the whole L), fits the double-buffered VMEM budget,
    divides L whenever possible (so no row padding is ever materialized), and leaves
    >= 4 grid steps when L permits so both v7x TensorCores get pipelined work.
    """
    max_tl = max(int(vmem_budget // max(per_l_bytes, 1)), 8)
    cap = max(min(max_tl, max_tile_positions), 8)
    divisors = [d for d in range(8, min(L, cap) + 1, 8) if L % d == 0]
    if divisors:
        pipelined = [d for d in divisors if L // d >= 4]
        return (pipelined[-1] if pipelined else divisors[-1]), False
    if L <= max_tl:
        return L, False            # one full-extent block: no alignment needs, no padding
    return min(cap, _round_up(L, 8)), True   # rare fallback: pad L up to the tile


def prenet_forward(source, weight, bias, pe_table):
    """Prenet forward (eval): ((source @ W + b) * sqrt(Dout)) + pe[:L].

    source: (L, B, Din); weight: (Din, Dout); bias: (Dout,); pe_table: (max_len, Dout).
    Returns (L, B, Dout) in source.dtype.
    """
    L, B, Din = source.shape
    Dout = weight.shape[1]
    if L > pe_table.shape[0]:
        raise ValueError(
            f"sequence length {L} exceeds the positional-encoding table "
            f"({pe_table.shape[0]} rows)"
        )
    scale = math.sqrt(float(Dout))
    x_dtype = source.dtype
    itemsize = jnp.dtype(x_dtype).itemsize

    # Fold sqrt(Dout) into the weight (kept in the model dtype -> native bf16 MXU path
    # when the model runs bf16) and the bias into the f32 PE rows. Eval-mode only
    # (dropout is identity); both are tiny one-off XLA ops.
    w_scaled = (weight.astype(jnp.float32) * scale).astype(x_dtype)            # (Din, Dout)
    add = pe_table[:L].astype(jnp.float32) + bias.astype(jnp.float32) * scale  # (L, Dout)

    # Free contiguous view: batch stays along lanes; no upcast, no feature padding.
    x2d = source.reshape(L, B * Din)

    # VMEM-aware sequence tiling. The resident weight is double-buffered by the pipeline
    # (constant index_map: the second copy is idle but still allocated), so budget for 2x.
    weight_vmem = 2 * Din * Dout * itemsize
    budget = max(int(_VMEM_LIMIT_BYTES * 3 // 4) - weight_vmem, 0)
    per_l = 2 * (B * Din * itemsize + Dout * 4 + B * Dout * itemsize)  # double-buffered x/add/out
    tl, needs_pad = _choose_seq_tile(L, B, per_l, budget)

    l_pad = _round_up(L, tl) if needs_pad else L
    if l_pad != L:  # rare: large L with no multiple-of-8 divisor that fits VMEM
        x2d = jnp.pad(x2d, ((0, l_pad - L), (0, 0)))
        add = jnp.pad(add, ((0, l_pad - L), (0, 0)))

    grid = (l_pad // tl,)

    cost = pl.CostEstimate(
        flops=2 * l_pad * B * Din * Dout,
        transcendentals=0,
        bytes_accessed=int(
            l_pad * B * Din * itemsize      # x
            + Din * Dout * itemsize         # weight
            + l_pad * Dout * 4              # pe + bias rows
            + l_pad * B * Dout * itemsize   # output
        ),
    )

    out = pl.pallas_call(
        functools.partial(_prenet_kernel, batch=B, dim_in=Din, dim_out=Dout),
        out_shape=jax.ShapeDtypeStruct((l_pad, B * Dout), x_dtype),
        grid_spec=pltpu.PrefetchScalarGridSpec(
            num_scalar_prefetch=0,
            grid=grid,
            in_specs=[
                pl.BlockSpec((tl, B * Din), lambda i: (i, 0)),   # x sequence tile
                pl.BlockSpec((Din, Dout), lambda i: (0, 0)),     # resident weight
                pl.BlockSpec((tl, Dout), lambda i: (i, 0)),      # per-position pe+bias
            ],
            out_specs=pl.BlockSpec((tl, B * Dout), lambda i: (i, 0)),
        ),
        compiler_params=pltpu.CompilerParams(
            dimension_semantics=("parallel",),
            vmem_limit_bytes=_VMEM_LIMIT_BYTES,
        ),
        cost_estimate=cost,
    )(x2d, w_scaled, add)

    if l_pad != L:
        out = out[:L]
    return out.reshape(L, B, Dout)   # free view back to (L, B, Dout)


if __name__ == "__main__":
    # Small shapes consistent with the module: seq_len=16, batch=2, dim_input=8, dim_output=32
    L, B, DIN, DOUT = 16, 2, 8, 32
    MAX_LEN = 1600

    key = jax.random.PRNGKey(0)
    k_x, k_w, k_b = jax.random.split(key, 3)

    source = jax.random.normal(k_x, (L, B, DIN), dtype=jnp.float32)
    # Deterministic "Linear" parameters (uniform like PyTorch's default init).
    bound = 1.0 / math.sqrt(DIN)
    weight = jax.random.uniform(k_w, (DIN, DOUT), jnp.float32, -bound, bound)
    bias = jax.random.uniform(k_b, (DOUT,), jnp.float32, -bound, bound)

    pe_table = make_positional_encoding(MAX_LEN, DOUT)

    out = prenet_forward(source, weight, bias, pe_table)
    out = jax.block_until_ready(out)

    # Cross-check against a plain-JAX reference of the same math.
    ref = (source.reshape(L * B, DIN) @ weight + bias).reshape(L, B, DOUT)
    ref = ref * math.sqrt(float(DOUT)) + pe_table[:L][:, None, :]
    assert out.shape == (L, B, DOUT)
    assert jnp.allclose(out, ref, atol=1e-5, rtol=1e-5)

    print("KERNEL_OK")
</pallas_src>

<mosaic_0001>
module attributes {stable_mosaic.version = 11 : i64} {
  func.func @_prenet_kernel(%arg0: i32, %arg1: memref<16x16xf32, #tpu.memory_space<vmem>>, %arg2: memref<8x32xf32, #tpu.memory_space<vmem>>, %arg3: memref<16x32xf32, #tpu.memory_space<vmem>>, %arg4: memref<16x64xf32, #tpu.memory_space<vmem>>) attributes {dimension_semantics = [#tpu.dimension_semantics<parallel>], iteration_bounds = array<i64: 1>, scalar_prefetch = 0 : i64, scratch_operands = 0 : i64, tpu.core_type = #tpu.core_type<tc>, window_params = [{transform_indices = @transform_0, window_bounds = array<i64: 16, 16>}, {pipeline_mode = #tpu.pipeline_mode<synchronous>, transform_indices = @transform_1, window_bounds = array<i64: 8, 32>}, {transform_indices = @transform_2, window_bounds = array<i64: 16, 32>}, {transform_indices = @transform_3, window_bounds = array<i64: 16, 64>}]} {
    %c0 = arith.constant 0 : index
    %c0_0 = arith.constant 0 : index
    %0 = vector.load %arg2[%c0, %c0_0] : memref<8x32xf32, #tpu.memory_space<vmem>>, vector<8x32xf32>
    %c0_1 = arith.constant 0 : index
    %c0_2 = arith.constant 0 : index
    %1 = vector.load %arg3[%c0_1, %c0_2] : memref<16x32xf32, #tpu.memory_space<vmem>>, vector<16x32xf32>
    %c0_3 = arith.constant 0 : index
    %c0_4 = arith.constant 0 : index
    %2 = vector.load %arg1[%c0_3, %c0_4] : memref<16x16xf32, #tpu.memory_space<vmem>>, vector<16x8xf32>
    %cst = arith.constant dense<0.000000e+00> : vector<16x32xf32>
    %3 = tpu.matmul %2, %0, %cst {dimension_numbers = #tpu.dot_dimension_numbers<[1], [0], [0], [1], [0, 0, 1, 1], [], []>} : vector<16x8xf32>, vector<8x32xf32>, vector<16x32xf32> -> vector<16x32xf32>
    %4 = arith.addf %3, %1 : vector<16x32xf32>
    %c0_5 = arith.constant 0 : index
    %c0_6 = arith.constant 0 : index
    %5 = vector.load %arg4[%c0_5, %c0_6] : memref<16x64xf32, #tpu.memory_space<vmem>>, vector<16x32xf32>
    tpu.vector_store %arg4[%c0_5, %c0_6], %4 {strides = array<i32>} : memref<16x64xf32, #tpu.memory_space<vmem>>, vector<16x32xf32>,
    %c0_7 = arith.constant 0 : index
    %c8 = arith.constant 8 : index
    %6 = vector.load %arg1[%c0_7, %c8] : memref<16x16xf32, #tpu.memory_space<vmem>>, vector<16x8xf32>
    %cst_8 = arith.constant dense<0.000000e+00> : vector<16x32xf32>
    %7 = tpu.matmul %6, %0, %cst_8 {dimension_numbers = #tpu.dot_dimension_numbers<[1], [0], [0], [1], [0, 0, 1, 1], [], []>} : vector<16x8xf32>, vector<8x32xf32>, vector<16x32xf32> -> vector<16x32xf32>
    %8 = arith.addf %7, %1 : vector<16x32xf32>
    %c0_9 = arith.constant 0 : index
    %c32 = arith.constant 32 : index
    %9 = vector.load %arg4[%c0_9, %c32] : memref<16x64xf32, #tpu.memory_space<vmem>>, vector<16x32xf32>
    tpu.vector_store %arg4[%c0_9, %c32], %8 {strides = array<i32>} : memref<16x64xf32, #tpu.memory_space<vmem>>, vector<16x32xf32>,
    return
  }
  func.func @transform_0(%arg0: i32) -> (i32, i32) {
    %c0_i32 = arith.constant 0 : i32
    %c0_i32_0 = arith.constant 0 : i32
    return %arg0, %c0_i32 : i32, i32
  }
  func.func @transform_1(%arg0: i32) -> (i32, i32) {
    %c0_i32 = arith.constant 0 : i32
    %c0_i32_0 = arith.constant 0 : i32
    %c0_i32_1 = arith.constant 0 : i32
    return %c0_i32, %c0_i32_0 : i32, i32
  }
  func.func @transform_2(%arg0: i32) -> (i32, i32) {
    %c0_i32 = arith.constant 0 : i32
    %c0_i32_0 = arith.constant 0 : i32
    return %arg0, %c0_i32 : i32, i32
  }
  func.func @transform_3(%arg0: i32) -> (i32, i32) {
    %c0_i32 = arith.constant 0 : i32
    %c0_i32_0 = arith.constant 0 : i32
    return %arg0, %c0_i32 : i32, i32
  }
}

</mosaic_0001>

<bundles_post_ra>
// kernel: tpu_custom_call.1
= control target key start
LH: loop header
LB: loop body
LE: loop exit
PB: predicated region body
PF: predicated region fallthrough
CT: control target
= control target key end

     0   :  { %8 = vsyncpa [#allocation3], 0  ;;  %s329_s0 = inlined_call_operand.hbm [shape: f32[16,16], index: 0, kind: input, shape index: {}]   ;;  %s330_s1 = inlined_call_operand.hbm [shape: f32[8,32], index: 1, kind: input, shape index: {}]   ;;  %s331_s2 = inlined_call_operand.hbm [shape: f32[16,32], index: 2, kind: input, shape index: {}]   ;;  %s332_s3 = inlined_call_operand.hbm [shape: f32[16,64], index: 3, kind: output, shape index: {}]  }
   0x1   :  { %9 = vsyncpa [#allocation6], 0  ;;  %s29_s14 = sshll.u32 %s330_s1, 4  ;;  %s30_s14 = int_to_ptr.hbm [resolvable:$true] %s29_s14 }
   0x2   :  { %10 = vsyncpa [#allocation4], 0  ;;  %s280_s15 = smov [#allocation5]   ;;  %s15_s19 = sshll.u32 %s329_s0, 4  ;;  %s16_s19 = int_to_ptr.hbm [resolvable:$true] %s15_s19 }
   0x3   :  { %s31_s16 = sshll.u32 %s280_s15, 4  ;;  %s281_s20 = smov [#allocation2]   ;;  %s32_s16 = int_to_ptr.vmem [resolvable:$true] %s31_s16 }
   0x4   :  { %34 = dma.hbm_to_vmem [thread:$0]  %s30_s14, 128, %s32_s16, [#allocation6]  }
   0x5   :  { %s17_s21 = sshll.u32 %s281_s20, 4  ;;  %s282_s22 = smov 128   ;;  %s18_s21 = int_to_ptr.vmem [resolvable:$true] %s17_s21 }
   0x6   :  { %s283_s23 = smov 8   ;;  %s39_s25 = sshll.u32 %s331_s2, 4  ;;  %s40_s25 = int_to_ptr.hbm [resolvable:$true] %s39_s25 }
   0x7   :  { %23 = dma.hbm_to_vmem [thread:$0]  %s16_s19, 256, %s18_s21, [#allocation3], %s282_s22, %s282_s22, %s283_s23  }
   0x8   :  { %s284_s26 = smov [#allocation7]  }
   0x9   :  { %s41_s27 = sshll.u32 %s284_s26, 4  ;;  %s42_s27 = int_to_ptr.vmem [resolvable:$true] %s41_s27 }
   0xa   :  { %47 = dma.hbm_to_vmem [thread:$0]  %s40_s25, 256, %s42_s27, [#allocation6], %s282_s22, %s282_s22, %s283_s23  }
   0xb   :  { %274 = dma.done.wait [#allocation3], 256  }
   0xc   :  { %275 = vsyncadd [#allocation3], 4294967040 }
   0xd   :  { %276 = dma.done.wait [#allocation6], 384  }
   0xe   :  { %277 = vsyncadd [#allocation6], 4294966912  ;;  %v99_v0 = vld [vmem:[#allocation2 + $0x8] sm:$0xff]  ;;  %s285_s0 = smov 120   ;;  %v98_v1 = vld [vmem:[#allocation2] sm:$0xff]  ;;  %vm65_vm0 = vcmask 64512  }
   0xf   :  { %104 = vrot.lane.b32.xlu0 %v99_v0, %s285_s0  ;;  %v60_v2 = vld [vmem:[#allocation5] sm:$0xff]  ;;  %v61_v5 = vld [vmem:[#allocation7] sm:$0xff]  ;;  %vm95_vm1 = vcmask 261120   ;;  %s286_s2 = smov 32   ;;  %v62_v10 = vld [vmem:[#allocation7 + $0x8] sm:$0xff]  ;;  %vm141_vm2 = vcmask 523520  }
  0x10   :  { %169 = vmatpush.msra.mxu3 %v60_v2  ;;  %125 = vmatpush.msra.mxu1 %v60_v2  ;;  %s287_s28 = smov [#allocation8]   ;;  %s150_s5 = sshll.u32 %s332_s3, 4  ;;  %s151_s5 = int_to_ptr.hbm [resolvable:$true] %s150_s5 }
  0x11   :  { %87 = vmatpush.msra.mxu0 %v60_v2  ;;  %168 = vmatpush.msra.mxu2 %v60_v2  ;;  %s148_s29 = sshll.u32 %s287_s28, 4  ;;  %s149_s29 = int_to_ptr.vmem [resolvable:$true] %s148_s29 }
  0x12   :  { %164 = vmatmul.msk.f32.vlgmr.msra.gmra.mxu0 %vm65_vm0, %v98_v1  ;;  %165 = vmatmul.msk.f32.vlgmr.msra.gmra.mxu2 %vm65_vm0, %v99_v0 }
  0x17   :  { %102 = vrot.lane.b32.xlu0 %v98_v1, %s285_s0 }
  0x81   :  { %v105_v3 = vpop.permute.xlu0 %104 }
  0x82   :  { %167 = vmatmul.msk.f32.vlgmr.msra.gmra.mxu3 %vm65_vm0, %v105_v3 }
  0x89   :  { %v103_v4 = vpop.permute.xlu0 %102 }
  0x8a   :  { %166 = vmatmul.msk.f32.vlgmr.msra.gmra.mxu1 %vm65_vm0, %v103_v4 }
  0x8f   :  { %v89_v6 = vpop.f32.mrf.mxu0 }
  0x90   :  { %v90_v7 = vadd.f32 %v89_v6, %v61_v5 }
  0x92   :  { %96 = vst.msk [vmem:[#allocation8] sm:$0xff] %vm95_vm1, %v90_v7 }
  0x95   :  { %v92_v13 = vpop.f32.mrf.mxu2 }
  0x96   :  { %v93_v14 = vadd.f32 %v92_v13, %v62_v10 }
  0x98   :  { %97 = vst.msk [vmem:[#allocation8 + $0x8] sm:$0xff] %vm95_vm1, %v93_v14 }
 0x105   :  { %v130_v11 = vpop.f32.mrf.mxu3 }
 0x106   :  { %v131_v12 = vadd.f32 %v130_v11, %v62_v10 }
 0x107   :  { %v127_v8 = vpop.f32.mrf.mxu1 }
 0x108   :  { %v128_v9 = vadd.f32 %v127_v8, %v61_v5 }
 0x10a   :  { %135 = vrot.lane.b32.xlu1 %v128_v9, %s286_s2 }
 0x112   :  { %137 = vrot.lane.b32.xlu1 %v131_v12, %s286_s2 }
 0x17c   :  { %v136_v15 = vpop.permute.xlu1 %135 }
 0x17d   :  { %142 = vst.msk [vmem:[#allocation8] sm:$0xff] %vm141_vm2, %v136_v15 }
 0x184   :  { %v138_v16 = vpop.permute.xlu1 %137 }
 0x185   :  { %143 = vst.msk [vmem:[#allocation8 + $0x8] sm:$0xff] %vm141_vm2, %v138_v16 }
 0x186   :  { %156 = dma.vmem_to_hbm [thread:$0]  %s149_s29, 256, %s151_s5, [#allocation4], %s282_s22, %s282_s22, %s283_s23  }
 0x187   :  { %278 = dma.done.wait [#allocation4], 256  }
 0x188   :  { %279 = vsyncadd [#allocation4], 4294967040 }
 0x189   :  { %161 = vsyncpa [#allocation3], 1 }
 0x18a   :  { %162 = vsyncpa [#allocation6], 1 }
 0x18b   :  { %163 = vsyncpa [#allocation4], 1 }

</bundles_post_ra>
